<compile_context>
chip_gen: v6e
topology: v6e:2x2x1
jax: 0.10.0
libtpu: 0.0.40
codegen_flags: <defaults>
</compile_context>

<pallas_src>
import jax
import jax.numpy as jnp
from jax.experimental import pallas as pl
from jax.experimental.pallas import tpu as pltpu


def _round_up(n: int, m: int) -> int:
    return ((n + m - 1) // m) * m


def ffn_kernel(x_ref, w1_ref, b1_ref, w2_ref, b2_ref, o_ref):
    # fc1 on the MXU: bf16 inputs, f32 accumulation.
    h = jnp.dot(x_ref[...], w1_ref[...], preferred_element_type=jnp.float32)
    # Bias + ReLU in f32 on the VPU (b1 is [1, hid_p], broadcasts over rows).
    h = jnp.maximum(h + b1_ref[...], 0.0)
    # fc2 on the MXU: cast the activation to the weight dtype (bf16).
    y = jnp.dot(h.astype(w2_ref.dtype), w2_ref[...],
                preferred_element_type=jnp.float32)
    o_ref[...] = (y + b2_ref[...]).astype(o_ref.dtype)


def feedforward(x, w1, b1, w2, b2, *, block_m: int = 128,
                out_dtype=jnp.float32):
    """x: [..., in_dim]; w1: [in_dim, out_dim]; b1: [1, out_dim];
       w2: [out_dim, labels]; b2: [1, labels]  ->  [..., labels].

    Weights are stored [in, out] (transposed vs. nn.Linear's [out, in]) so the
    kernel is a plain x @ W + b on the MXU.
    """
    in_dim = x.shape[-1]
    out_dim = w1.shape[1]
    labels = w2.shape[1]
    lead_shape = x.shape[:-1]

    # Fold all leading dims into one batch axis so the MXU sees many rows.
    x2 = x.reshape(-1, in_dim)
    B = x2.shape[0]

    # Lane-dense padding (multiples of 128 on the lane axis); batch tile is a
    # sublane multiple (8) capped at block_m.
    in_p = _round_up(in_dim, 128)
    hid_p = _round_up(out_dim, 128)
    lab_p = _round_up(labels, 128)
    tm = min(block_m, _round_up(B, 8))
    Bp = _round_up(B, tm)

    def pad2(a, rows, cols):
        r, c = a.shape
        if r == rows and c == cols:
            return a
        return jnp.pad(a, ((0, rows - r), (0, cols - c)))

    # bf16 inputs for the MXU; biases stay f32 for the epilogue.
    x_p = pad2(x2, Bp, in_p).astype(jnp.bfloat16)
    w1_p = pad2(w1, in_p, hid_p).astype(jnp.bfloat16)
    w2_p = pad2(w2, hid_p, lab_p).astype(jnp.bfloat16)
    b1_p = pad2(b1, 1, hid_p).astype(jnp.float32)
    b2_p = pad2(b2, 1, lab_p).astype(jnp.float32)

    grid = (pl.cdiv(Bp, tm),)

    # Rough VMEM budget: double-buffered tiles + resident weights + headroom.
    vmem_est = 2 * (tm * in_p * 2 + in_p * hid_p * 2 + hid_p * 4
                    + hid_p * lab_p * 2 + lab_p * 4 + tm * lab_p * 4) \
               + tm * hid_p * 4
    vmem_limit = int(min(max(2 * vmem_est, 16 * 2**20), 64 * 2**20))

    # TODO(synk): for very large in_dim/out_dim (real transformer sizes on
    # v7x's 64 MiB VMEM), add a reduction grid axis over the hidden dim with a
    # VMEM f32 accumulator instead of keeping W1/W2 fully resident.
    out_p = pl.pallas_call(
        ffn_kernel,
        out_shape=jax.ShapeDtypeStruct((Bp, lab_p), out_dtype),
        grid=grid,
        in_specs=[
            pl.BlockSpec((tm, in_p), lambda i: (i, 0)),      # x tile streams
            pl.BlockSpec((in_p, hid_p), lambda i: (0, 0)),   # W1 resident
            pl.BlockSpec((1, hid_p), lambda i: (0, 0)),      # b1 resident
            pl.BlockSpec((hid_p, lab_p), lambda i: (0, 0)),  # W2 resident
            pl.BlockSpec((1, lab_p), lambda i: (0, 0)),      # b2 resident
        ],
        out_specs=pl.BlockSpec((tm, lab_p), lambda i: (i, 0)),
        compiler_params=pltpu.CompilerParams(
            dimension_semantics=("parallel",),
            vmem_limit_bytes=vmem_limit,
        ),
    )(x_p, w1_p, b1_p, w2_p, b2_p)

    # Strip batch / label padding and restore leading dims.
    return out_p[:B, :labels].reshape(*lead_shape, labels)


if __name__ == "__main__":
    # Small shapes consistent with FeedForward(in_dim, out_dim, labels).
    B, in_dim, out_dim, labels = 8, 32, 64, 4

    key = jax.random.PRNGKey(0)
    kx, kw1, kb1, kw2, kb2, kx3 = jax.random.split(key, 6)

    # Deterministic init mimicking nn.Linear's uniform(-1/sqrt(fan_in), ...).
    bound1 = 1.0 / jnp.sqrt(in_dim)
    bound2 = 1.0 / jnp.sqrt(out_dim)
    w1 = jax.random.uniform(kw1, (in_dim, out_dim), jnp.float32, -bound1, bound1)
    b1 = jax.random.uniform(kb1, (1, out_dim), jnp.float32, -bound1, bound1)
    w2 = jax.random.uniform(kw2, (out_dim, labels), jnp.float32, -bound2, bound2)
    b2 = jax.random.uniform(kb2, (1, labels), jnp.float32, -bound2, bound2)

    ffn = jax.jit(feedforward)

    # 2-D input [B, in_dim].
    x = jax.random.normal(kx, (B, in_dim), jnp.float32)
    out = jax.block_until_ready(ffn(x, w1, b1, w2, b2))
    ref = jnp.maximum(x @ w1 + b1, 0.0) @ w2 + b2
    assert out.shape == (B, labels)
    # bf16 MXU inputs with f32 accumulation -> loosened tolerance vs f32 ref.
    assert jnp.allclose(out, ref, atol=3e-2, rtol=3e-2)

    # 3-D input [batch, seq, in_dim]: leading dims are folded into one M axis.
    x3 = jax.random.normal(kx3, (2, 5, in_dim), jnp.float32)
    out3 = jax.block_until_ready(ffn(x3, w1, b1, w2, b2))
    ref3 = jnp.maximum(x3 @ w1 + b1, 0.0) @ w2 + b2
    assert out3.shape == (2, 5, labels)
    assert jnp.allclose(out3, ref3, atol=3e-2, rtol=3e-2)

    print("KERNEL_OK")
</pallas_src>

<mosaic_0001>
module attributes {stable_mosaic.version = 11 : i64} {
  func.func @ffn_kernel(%arg0: i32, %arg1: memref<8x128xbf16, #tpu.memory_space<vmem>>, %arg2: memref<128x128xbf16, #tpu.memory_space<vmem>>, %arg3: memref<1x128xf32, #tpu.memory_space<vmem>>, %arg4: memref<128x128xbf16, #tpu.memory_space<vmem>>, %arg5: memref<1x128xf32, #tpu.memory_space<vmem>>, %arg6: memref<8x128xf32, #tpu.memory_space<vmem>>) attributes {dimension_semantics = [#tpu.dimension_semantics<parallel>], iteration_bounds = array<i64: 1>, scalar_prefetch = 0 : i64, scratch_operands = 0 : i64, tpu.core_type = #tpu.core_type<tc>, window_params = [{transform_indices = @transform_0, window_bounds = array<i64: 8, 128>}, {pipeline_mode = #tpu.pipeline_mode<synchronous>, transform_indices = @transform_1, window_bounds = array<i64: 128, 128>}, {pipeline_mode = #tpu.pipeline_mode<synchronous>, transform_indices = @transform_2, window_bounds = array<i64: 1, 128>}, {pipeline_mode = #tpu.pipeline_mode<synchronous>, transform_indices = @transform_3, window_bounds = array<i64: 128, 128>}, {pipeline_mode = #tpu.pipeline_mode<synchronous>, transform_indices = @transform_4, window_bounds = array<i64: 1, 128>}, {transform_indices = @transform_5, window_bounds = array<i64: 8, 128>}]} {
    %c0 = arith.constant 0 : index
    %c0_0 = arith.constant 0 : index
    %0 = vector.load %arg1[%c0, %c0_0] : memref<8x128xbf16, #tpu.memory_space<vmem>>, vector<8x128xbf16>
    %c0_1 = arith.constant 0 : index
    %c0_2 = arith.constant 0 : index
    %1 = vector.load %arg2[%c0_1, %c0_2] : memref<128x128xbf16, #tpu.memory_space<vmem>>, vector<128x128xbf16>
    %cst = arith.constant dense<0.000000e+00> : vector<8x128xf32>
    %2 = tpu.matmul %0, %1, %cst {dimension_numbers = #tpu.dot_dimension_numbers<[1], [0], [0], [1], [0, 0, 1, 1], [], []>} : vector<8x128xbf16>, vector<128x128xbf16>, vector<8x128xf32> -> vector<8x128xf32>
    %c0_3 = arith.constant 0 : index
    %c0_4 = arith.constant 0 : index
    %3 = vector.load %arg3[%c0_3, %c0_4] : memref<1x128xf32, #tpu.memory_space<vmem>>, vector<1x128xf32>
    %4 = vector.broadcast %3 : vector<1x128xf32> to vector<8x128xf32>
    %5 = arith.addf %2, %4 : vector<8x128xf32>
    %cst_5 = arith.constant 0.000000e+00 : f32
    %6 = vector.broadcast %cst_5 : f32 to vector<8x128xf32>
    %7 = arith.maximumf %5, %6 : vector<8x128xf32>
    %8 = arith.truncf %7 : vector<8x128xf32> to vector<8x128xbf16>
    %c0_6 = arith.constant 0 : index
    %c0_7 = arith.constant 0 : index
    %9 = vector.load %arg4[%c0_6, %c0_7] : memref<128x128xbf16, #tpu.memory_space<vmem>>, vector<128x128xbf16>
    %cst_8 = arith.constant dense<0.000000e+00> : vector<8x128xf32>
    %10 = tpu.matmul %8, %9, %cst_8 {dimension_numbers = #tpu.dot_dimension_numbers<[1], [0], [0], [1], [0, 0, 1, 1], [], []>} : vector<8x128xbf16>, vector<128x128xbf16>, vector<8x128xf32> -> vector<8x128xf32>
    %c0_9 = arith.constant 0 : index
    %c0_10 = arith.constant 0 : index
    %11 = vector.load %arg5[%c0_9, %c0_10] : memref<1x128xf32, #tpu.memory_space<vmem>>, vector<1x128xf32>
    %12 = vector.broadcast %11 : vector<1x128xf32> to vector<8x128xf32>
    %13 = arith.addf %10, %12 : vector<8x128xf32>
    %c0_11 = arith.constant 0 : index
    %c0_12 = arith.constant 0 : index
    %14 = vector.load %arg6[%c0_11, %c0_12] : memref<8x128xf32, #tpu.memory_space<vmem>>, vector<8x128xf32>
    tpu.vector_store %arg6[%c0_11, %c0_12], %13 {strides = array<i32>} : memref<8x128xf32, #tpu.memory_space<vmem>>, vector<8x128xf32>,
    return
  }
  func.func @transform_0(%arg0: i32) -> (i32, i32) {
    %c0_i32 = arith.constant 0 : i32
    %c0_i32_0 = arith.constant 0 : i32
    return %arg0, %c0_i32 : i32, i32
  }
  func.func @transform_1(%arg0: i32) -> (i32, i32) {
    %c0_i32 = arith.constant 0 : i32
    %c0_i32_0 = arith.constant 0 : i32
    %c0_i32_1 = arith.constant 0 : i32
    return %c0_i32, %c0_i32_0 : i32, i32
  }
  func.func @transform_2(%arg0: i32) -> (i32, i32) {
    %c0_i32 = arith.constant 0 : i32
    %c0_i32_0 = arith.constant 0 : i32
    %c0_i32_1 = arith.constant 0 : i32
    return %c0_i32, %c0_i32_0 : i32, i32
  }
  func.func @transform_3(%arg0: i32) -> (i32, i32) {
    %c0_i32 = arith.constant 0 : i32
    %c0_i32_0 = arith.constant 0 : i32
    %c0_i32_1 = arith.constant 0 : i32
    return %c0_i32, %c0_i32_0 : i32, i32
  }
  func.func @transform_4(%arg0: i32) -> (i32, i32) {
    %c0_i32 = arith.constant 0 : i32
    %c0_i32_0 = arith.constant 0 : i32
    %c0_i32_1 = arith.constant 0 : i32
    return %c0_i32, %c0_i32_0 : i32, i32
  }
  func.func @transform_5(%arg0: i32) -> (i32, i32) {
    %c0_i32 = arith.constant 0 : i32
    %c0_i32_0 = arith.constant 0 : i32
    return %arg0, %c0_i32 : i32, i32
  }
}

</mosaic_0001>

<bundles_post_ra>
// kernel: feedforward.1
= control target key start
LH: loop header
LB: loop body
LE: loop exit
PB: predicated region body
PF: predicated region fallthrough
CT: control target
= control target key end

     0   :  { %v345_v0 = vmov 0.0   ;;  %vm346_vm0 = vmmov 0   ;;  %s437_s1 = inlined_call_operand.vmem [shape: bf16[128,128], index: 1, kind: input, shape index: {}]   ;;  %s438_s3 = inlined_call_operand.vmem [shape: bf16[128,128], index: 3, kind: input, shape index: {}]   ;;  %s439_s0 = inlined_call_operand.vmem [shape: bf16[8,128], index: 0, kind: input, shape index: {}]   ;;  %s440_s2 = inlined_call_operand.vmem [shape: f32[1,128], index: 2, kind: input, shape index: {}]   ;;  %s441_s4 = inlined_call_operand.vmem [shape: f32[1,128], index: 4, kind: input, shape index: {}]   ;;  %s442_s5 = inlined_call_operand.vmem [shape: f32[8,128], index: 5, kind: output, shape index: {}]  }
   0x1   :  { %287 = vmatprep.subr.bf16.mxu0 %v345_v0  ;;  %v329_v1 = vld [vmem:[%s437_s1 + $0x38] sm:$0xff]   ;;  %303 = vmatprep.mubr.msk.bf16.mxu0 %vm346_vm0, %v345_v0  ;;  %v330_v2 = vld [vmem:[%s437_s1 + $0x30] sm:$0xff]   ;;  %v331_v3 = vld [vmem:[%s437_s1 + $0x28] sm:$0xff]  }
   0x2   :  { %307 = vmatprep.subr.bf16.mxu1 %v345_v0  ;;  %323 = vmatprep.mubr.msk.bf16.mxu1 %vm346_vm0, %v345_v0  ;;  %v337_v4 = vld [vmem:[%s438_s3 + $0x38] sm:$0xff]   ;;  %v332_v5 = vld [vmem:[%s437_s1 + $0x20] sm:$0xff]   ;;  %v338_v6 = vld [vmem:[%s438_s3 + $0x30] sm:$0xff]  }
   0x3   :  { %288 = vmatpush3.bf16.msra.mxu0 %v329_v1  ;;  %308 = vmatpush3.bf16.msra.mxu1 %v337_v4  ;;  %v333_v7 = vld [vmem:[%s437_s1 + $0x18] sm:$0xff]   ;;  %v339_v8 = vld [vmem:[%s438_s3 + $0x28] sm:$0xff]   ;;  %v334_v9 = vld [vmem:[%s437_s1 + $0x10] sm:$0xff]  }
   0x4   :  { %289 = vmatprep.subr.bf16.mxu0 %v345_v0  ;;  %309 = vmatprep.subr.bf16.mxu1 %v345_v0  ;;  %v340_v10 = vld [vmem:[%s438_s3 + $0x20] sm:$0xff]   ;;  %v335_v11 = vld [vmem:[%s437_s1 + $0x8] sm:$0xff]   ;;  %v341_v12 = vld [vmem:[%s438_s3 + $0x18] sm:$0xff]  }
   0x5   :  { %v336_v13 = vld [vmem:[%s437_s1] sm:$0xff]   ;;  %v342_v14 = vld [vmem:[%s438_s3 + $0x10] sm:$0xff]   ;;  %v343_v16 = vld [vmem:[%s438_s3 + $0x8] sm:$0xff]  }
   0x6   :  { %v21_v15 = vld [vmem:[%s439_s0] sm:$0xf] }
   0x7   :  { %290 = vmatpush3.bf16.msra.mxu0 %v330_v2  ;;  %310 = vmatpush3.bf16.msra.mxu1 %v338_v6  ;;  %v344_v17 = vld [vmem:[%s438_s3] sm:$0xff]  }
   0x8   :  { %291 = vmatprep.subr.bf16.mxu0 %v345_v0  ;;  %311 = vmatprep.subr.bf16.mxu1 %v345_v0  ;;  %v251_v18 = vld [vmem:[%s440_s2] ss:$0 sm:$0xff] }
   0x9   :  { %v260_v26 = vld [vmem:[%s441_s4] ss:$0 sm:$0xff] }
   0xb   :  { %292 = vmatpush3.bf16.msra.mxu0 %v331_v3  ;;  %312 = vmatpush3.bf16.msra.mxu1 %v339_v8 }
   0xc   :  { %293 = vmatprep.subr.bf16.mxu0 %v345_v0  ;;  %313 = vmatprep.subr.bf16.mxu1 %v345_v0 }
   0xf   :  { %294 = vmatpush3.bf16.msra.mxu0 %v332_v5  ;;  %314 = vmatpush3.bf16.msra.mxu1 %v340_v10 }
  0x10   :  { %295 = vmatprep.subr.bf16.mxu0 %v345_v0  ;;  %315 = vmatprep.subr.bf16.mxu1 %v345_v0 }
  0x13   :  { %296 = vmatpush3.bf16.msra.mxu0 %v333_v7  ;;  %316 = vmatpush3.bf16.msra.mxu1 %v341_v12 }
  0x14   :  { %297 = vmatprep.subr.bf16.mxu0 %v345_v0  ;;  %317 = vmatprep.subr.bf16.mxu1 %v345_v0 }
  0x17   :  { %298 = vmatpush3.bf16.msra.mxu0 %v334_v9  ;;  %318 = vmatpush3.bf16.msra.mxu1 %v342_v14 }
  0x18   :  { %299 = vmatprep.subr.bf16.mxu0 %v345_v0  ;;  %319 = vmatprep.subr.bf16.mxu1 %v345_v0 }
  0x1b   :  { %300 = vmatpush3.bf16.msra.mxu0 %v335_v11  ;;  %320 = vmatpush3.bf16.msra.mxu1 %v343_v16 }
  0x1c   :  { %301 = vmatprep.subr.bf16.mxu0 %v345_v0  ;;  %321 = vmatprep.subr.bf16.mxu1 %v345_v0 }
  0x1f   :  { %302 = vmatpush3.bf16.msra.mxu0 %v336_v13  ;;  %322 = vmatpush3.bf16.msra.mxu1 %v344_v17 }
  0x22   :  { %304 = vmatmul.mubr.bf16.vlgmr.msra.gmra.mxu0 %v21_v15 }
  0xe2   :  { %v127_v19 = vpop.f32.mrf.mxu0 }
  0xe3   :  { %v128_v20 = vadd.f32 %v251_v18, %v127_v19 }
  0xe4   :  { %v305_v21 = vpop.f32.mrf.mxu0 }
  0xe5   :  { %v133_v22 = vmax.f32 %v128_v20, 0.0 }
  0xe6   :  { %v130_v23 = vpop.f32.mrf.mxu0 }
  0xe7   :  { %v134_v24 = vpack.c.bf16 %v133_v22, %v133_v22 }
  0xe8   :  { %v306_v25 = vpop.f32.mrf.mxu0 }
  0xe9   :  { %324 = vmatmul.mubr.bf16.vlgmr.msra.gmra.mxu1 %v134_v24 }
 0x1a9   :  { %v240_v27 = vpop.f32.mrf.mxu1 }
 0x1aa   :  { %v241_v28 = vadd.f32 %v260_v26, %v240_v27 }
 0x1ab   :  { %v325_v29 = vpop.f32.mrf.mxu1 }
 0x1ac   :  { %246 = vst [vmem:[%s442_s5] sm:$0xff] %v241_v28 }
 0x1ad   :  { %v243_v30 = vpop.f32.mrf.mxu1 }
 0x1af   :  { %v326_v31 = vpop.f32.mrf.mxu1 }

</bundles_post_ra>
